<compile_context>
chip_gen: v5e
topology: v5e:2x2
jax: 0.10.0
libtpu: 0.0.40
codegen_flags: <defaults>
</compile_context>

<pallas_src>
import jax
import jax.numpy as jnp
from jax.experimental import pallas as pl
from jax.experimental.pallas import tpu as pltpu

BN_EPS = 1e-5  # PyTorch BatchNorm1d default


def _round_up(x, m):
    return (x + m - 1) // m * m


def _mlp_head_kernel(x_ref, w1_ref, b1_ref, w2_ref, b2_ref, w3_ref, b3_ref, out_ref):
    # x / weights are bf16, biases (BN-folded) are f32, accumulation is f32.
    x = x_ref[...]

    h1 = jnp.dot(x, w1_ref[...], preferred_element_type=jnp.float32) + b1_ref[...]
    h1 = jnp.maximum(h1, 0.0).astype(jnp.bfloat16)          # ReLU (Dropout = identity)

    h2 = jnp.dot(h1, w2_ref[...], preferred_element_type=jnp.float32) + b2_ref[...]
    h2 = jnp.maximum(h2, 0.0).astype(jnp.bfloat16)          # ReLU (Dropout = identity)

    out_ref[...] = (
        jnp.dot(h2, w3_ref[...], preferred_element_type=jnp.float32) + b3_ref[...]
    )


@jax.jit
def classifier_head(x, params):
    """Fused classifier head. x: [B, H] pooled encoder output (f32)."""
    B, H = x.shape
    num_labels = params["w3"].shape[1]

    # ---- Fold BatchNorm into Linear (eval mode: running stats). ----
    s1 = params["bn1_gamma"] * jax.lax.rsqrt(params["bn1_var"] + BN_EPS)
    w1 = params["w1"] * s1[None, :]
    b1 = (params["b1"] - params["bn1_mean"]) * s1 + params["bn1_beta"]

    s2 = params["bn2_gamma"] * jax.lax.rsqrt(params["bn2_var"] + BN_EPS)
    w2 = params["w2"] * s2[None, :]
    b2 = (params["b2"] - params["bn2_mean"]) * s2 + params["bn2_beta"]

    w3, b3 = params["w3"], params["b3"]

    # ---- Padding to MXU / lane-friendly sizes. ----
    Hp = _round_up(H, 128)                       # contraction dim of layer 1
    NLp = _round_up(num_labels, 128)             # lane-dense output width
    TB = min(512, _round_up(B, 8))               # batch tile (>= 8 sublanes)
    Bp = _round_up(B, TB)

    x_p = jnp.pad(x, ((0, Bp - B), (0, Hp - H))).astype(jnp.bfloat16)
    w1_p = jnp.pad(w1, ((0, Hp - H), (0, 0))).astype(jnp.bfloat16)
    w2_p = w2.astype(jnp.bfloat16)
    w3_p = jnp.pad(w3, ((0, 0), (0, NLp - num_labels))).astype(jnp.bfloat16)

    b1_r = b1.reshape(1, -1).astype(jnp.float32)
    b2_r = b2.reshape(1, -1).astype(jnp.float32)
    b3_r = jnp.pad(b3, (0, NLp - num_labels)).reshape(1, -1).astype(jnp.float32)

    grid = (Bp // TB,)
    out = pl.pallas_call(
        _mlp_head_kernel,
        out_shape=jax.ShapeDtypeStruct((Bp, NLp), jnp.float32),
        grid=grid,
        in_specs=[
            pl.BlockSpec((TB, Hp), lambda i: (i, 0)),      # x tile (pipelined over B)
            pl.BlockSpec((Hp, 512), lambda i: (0, 0)),     # W1 (VMEM-resident)
            pl.BlockSpec((1, 512), lambda i: (0, 0)),      # b1 (BN-folded)
            pl.BlockSpec((512, 256), lambda i: (0, 0)),    # W2
            pl.BlockSpec((1, 256), lambda i: (0, 0)),      # b2 (BN-folded)
            pl.BlockSpec((256, NLp), lambda i: (0, 0)),    # W3 (lane-padded)
            pl.BlockSpec((1, NLp), lambda i: (0, 0)),      # b3 (lane-padded)
        ],
        out_specs=pl.BlockSpec((TB, NLp), lambda i: (i, 0)),
        compiler_params=pltpu.CompilerParams(dimension_semantics=("parallel",)),
    )(x_p, w1_p, b1_r, w2_p, b2_r, w3_p, b3_r)

    return out[:B, :num_labels]


def init_params(key, hidden_size, num_labels):
    """Deterministic synthetic init for the classifier head parameters."""
    keys = jax.random.split(key, 16)
    dims = [(hidden_size, 512), (512, 256), (256, num_labels)]
    p = {}
    for i, (fan_in, fan_out) in enumerate(dims, start=1):
        bound = 1.0 / jnp.sqrt(fan_in)
        p[f"w{i}"] = jax.random.uniform(
            keys[2 * i - 2], (fan_in, fan_out), jnp.float32, -bound, bound)
        p[f"b{i}"] = jax.random.uniform(
            keys[2 * i - 1], (fan_out,), jnp.float32, -bound, bound)
    # BatchNorm1d: gamma/beta learnable, mean/var running stats (non-trivial).
    for i, f in ((1, 512), (2, 256)):
        p[f"bn{i}_gamma"] = 1.0 + 0.1 * jax.random.normal(keys[5 + 2 * i], (f,), jnp.float32)
        p[f"bn{i}_beta"] = 0.1 * jax.random.normal(keys[6 + 2 * i], (f,), jnp.float32)
        p[f"bn{i}_mean"] = 0.05 * jax.random.normal(keys[9 + i], (f,), jnp.float32)
        p[f"bn{i}_var"] = jnp.abs(1.0 + 0.1 * jax.random.normal(keys[11 + i], (f,), jnp.float32))
    return p


def _reference_f32(x, p):
    """Pure-JAX f32 reference of the original head (eval mode)."""
    hp = jax.lax.Precision.HIGHEST
    h = jnp.dot(x, p["w1"], precision=hp) + p["b1"]
    h = (h - p["bn1_mean"]) / jnp.sqrt(p["bn1_var"] + BN_EPS) * p["bn1_gamma"] + p["bn1_beta"]
    h = jnp.maximum(h, 0.0)
    h = jnp.dot(h, p["w2"], precision=hp) + p["b2"]
    h = (h - p["bn2_mean"]) / jnp.sqrt(p["bn2_var"] + BN_EPS) * p["bn2_gamma"] + p["bn2_beta"]
    h = jnp.maximum(h, 0.0)
    return jnp.dot(h, p["w3"], precision=hp) + p["b3"]


def _reference_bf16(x, p):
    """Reference that mirrors the kernel's BN fold + bf16 quantization."""
    hp = jax.lax.Precision.HIGHEST
    bf = lambda a: a.astype(jnp.bfloat16).astype(jnp.float32)
    s1 = p["bn1_gamma"] * jax.lax.rsqrt(p["bn1_var"] + BN_EPS)
    w1 = bf(p["w1"] * s1[None, :])
    b1 = (p["b1"] - p["bn1_mean"]) * s1 + p["bn1_beta"]
    s2 = p["bn2_gamma"] * jax.lax.rsqrt(p["bn2_var"] + BN_EPS)
    w2 = bf(p["w2"] * s2[None, :])
    b2 = (p["b2"] - p["bn2_mean"]) * s2 + p["bn2_beta"]
    w3 = bf(p["w3"])

    h = jnp.dot(bf(x), w1, precision=hp) + b1
    h = bf(jnp.maximum(h, 0.0))
    h = jnp.dot(h, w2, precision=hp) + b2
    h = bf(jnp.maximum(h, 0.0))
    return jnp.dot(h, w3, precision=hp) + p["b3"]


if __name__ == "__main__":
    hidden_size = 64   # config.hidden_size (small test size)
    num_labels = 4     # config.num_labels
    batch = 8

    key = jax.random.PRNGKey(0)
    k_x, k_p = jax.random.split(key)
    # Stand-in for outputs.pooler_output of the encoder: [B, hidden_size].
    pooled_output = jax.random.normal(k_x, (batch, hidden_size), jnp.float32)
    params = init_params(k_p, hidden_size, num_labels)

    logits = classifier_head(pooled_output, params)
    jax.block_until_ready(logits)
    assert logits.shape == (batch, num_labels)

    # Tight check against a reference that mirrors the kernel's bf16 path.
    ref_q = _reference_bf16(pooled_output, params)
    assert jnp.allclose(logits, ref_q, atol=1e-3, rtol=1e-3), "mismatch vs bf16 reference"

    # Loose semantic check against the original f32 module math.
    ref_f32 = _reference_f32(pooled_output, params)
    assert jnp.allclose(logits, ref_f32, atol=1e-1, rtol=1e-1), "mismatch vs f32 reference"

    print("KERNEL_OK")
</pallas_src>

<mosaic_0001>
module attributes {stable_mosaic.version = 11 : i64} {
  func.func @_mlp_head_kernel(%arg0: i32, %arg1: memref<8x128xbf16, #tpu.memory_space<vmem>>, %arg2: memref<128x512xbf16, #tpu.memory_space<vmem>>, %arg3: memref<1x512xf32, #tpu.memory_space<vmem>>, %arg4: memref<512x256xbf16, #tpu.memory_space<vmem>>, %arg5: memref<1x256xf32, #tpu.memory_space<vmem>>, %arg6: memref<256x128xbf16, #tpu.memory_space<vmem>>, %arg7: memref<1x128xf32, #tpu.memory_space<vmem>>, %arg8: memref<8x128xf32, #tpu.memory_space<vmem>>) attributes {dimension_semantics = [#tpu.dimension_semantics<parallel>], iteration_bounds = array<i64: 1>, scalar_prefetch = 0 : i64, scratch_operands = 0 : i64, tpu.core_type = #tpu.core_type<tc>, window_params = [{transform_indices = @transform_0, window_bounds = array<i64: 8, 128>}, {pipeline_mode = #tpu.pipeline_mode<synchronous>, transform_indices = @transform_1, window_bounds = array<i64: 128, 512>}, {pipeline_mode = #tpu.pipeline_mode<synchronous>, transform_indices = @transform_2, window_bounds = array<i64: 1, 512>}, {pipeline_mode = #tpu.pipeline_mode<synchronous>, transform_indices = @transform_3, window_bounds = array<i64: 512, 256>}, {pipeline_mode = #tpu.pipeline_mode<synchronous>, transform_indices = @transform_4, window_bounds = array<i64: 1, 256>}, {pipeline_mode = #tpu.pipeline_mode<synchronous>, transform_indices = @transform_5, window_bounds = array<i64: 256, 128>}, {pipeline_mode = #tpu.pipeline_mode<synchronous>, transform_indices = @transform_6, window_bounds = array<i64: 1, 128>}, {transform_indices = @transform_7, window_bounds = array<i64: 8, 128>}]} {
    %c0 = arith.constant 0 : index
    %c0_0 = arith.constant 0 : index
    %0 = vector.load %arg1[%c0, %c0_0] : memref<8x128xbf16, #tpu.memory_space<vmem>>, vector<8x128xbf16>
    %c0_1 = arith.constant 0 : index
    %c0_2 = arith.constant 0 : index
    %1 = vector.load %arg2[%c0_1, %c0_2] : memref<128x512xbf16, #tpu.memory_space<vmem>>, vector<128x512xbf16>
    %cst = arith.constant dense<0.000000e+00> : vector<8x512xf32>
    %2 = tpu.matmul %0, %1, %cst {dimension_numbers = #tpu.dot_dimension_numbers<[1], [0], [0], [1], [0, 0, 1, 1], [], []>} : vector<8x128xbf16>, vector<128x512xbf16>, vector<8x512xf32> -> vector<8x512xf32>
    %c0_3 = arith.constant 0 : index
    %c0_4 = arith.constant 0 : index
    %3 = vector.load %arg3[%c0_3, %c0_4] : memref<1x512xf32, #tpu.memory_space<vmem>>, vector<1x512xf32>
    %4 = vector.broadcast %3 : vector<1x512xf32> to vector<8x512xf32>
    %5 = arith.addf %2, %4 : vector<8x512xf32>
    %cst_5 = arith.constant 0.000000e+00 : f32
    %6 = vector.broadcast %cst_5 : f32 to vector<8x512xf32>
    %7 = arith.maximumf %5, %6 : vector<8x512xf32>
    %8 = arith.truncf %7 : vector<8x512xf32> to vector<8x512xbf16>
    %c0_6 = arith.constant 0 : index
    %c0_7 = arith.constant 0 : index
    %9 = vector.load %arg4[%c0_6, %c0_7] : memref<512x256xbf16, #tpu.memory_space<vmem>>, vector<512x256xbf16>
    %cst_8 = arith.constant dense<0.000000e+00> : vector<8x256xf32>
    %10 = tpu.matmul %8, %9, %cst_8 {dimension_numbers = #tpu.dot_dimension_numbers<[1], [0], [0], [1], [0, 0, 1, 1], [], []>} : vector<8x512xbf16>, vector<512x256xbf16>, vector<8x256xf32> -> vector<8x256xf32>
    %c0_9 = arith.constant 0 : index
    %c0_10 = arith.constant 0 : index
    %11 = vector.load %arg5[%c0_9, %c0_10] : memref<1x256xf32, #tpu.memory_space<vmem>>, vector<1x256xf32>
    %12 = vector.broadcast %11 : vector<1x256xf32> to vector<8x256xf32>
    %13 = arith.addf %10, %12 : vector<8x256xf32>
    %cst_11 = arith.constant 0.000000e+00 : f32
    %14 = vector.broadcast %cst_11 : f32 to vector<8x256xf32>
    %15 = arith.maximumf %13, %14 : vector<8x256xf32>
    %16 = arith.truncf %15 : vector<8x256xf32> to vector<8x256xbf16>
    %c0_12 = arith.constant 0 : index
    %c0_13 = arith.constant 0 : index
    %17 = vector.load %arg6[%c0_12, %c0_13] : memref<256x128xbf16, #tpu.memory_space<vmem>>, vector<256x128xbf16>
    %cst_14 = arith.constant dense<0.000000e+00> : vector<8x128xf32>
    %18 = tpu.matmul %16, %17, %cst_14 {dimension_numbers = #tpu.dot_dimension_numbers<[1], [0], [0], [1], [0, 0, 1, 1], [], []>} : vector<8x256xbf16>, vector<256x128xbf16>, vector<8x128xf32> -> vector<8x128xf32>
    %c0_15 = arith.constant 0 : index
    %c0_16 = arith.constant 0 : index
    %19 = vector.load %arg7[%c0_15, %c0_16] : memref<1x128xf32, #tpu.memory_space<vmem>>, vector<1x128xf32>
    %20 = vector.broadcast %19 : vector<1x128xf32> to vector<8x128xf32>
    %21 = arith.addf %18, %20 : vector<8x128xf32>
    %c0_17 = arith.constant 0 : index
    %c0_18 = arith.constant 0 : index
    %22 = vector.load %arg8[%c0_17, %c0_18] : memref<8x128xf32, #tpu.memory_space<vmem>>, vector<8x128xf32>
    tpu.vector_store %arg8[%c0_17, %c0_18], %21 {strides = array<i32>} : memref<8x128xf32, #tpu.memory_space<vmem>>, vector<8x128xf32>,
    return
  }
  func.func @transform_0(%arg0: i32) -> (i32, i32) {
    %c0_i32 = arith.constant 0 : i32
    %c0_i32_0 = arith.constant 0 : i32
    return %arg0, %c0_i32 : i32, i32
  }
  func.func @transform_1(%arg0: i32) -> (i32, i32) {
    %c0_i32 = arith.constant 0 : i32
    %c0_i32_0 = arith.constant 0 : i32
    %c0_i32_1 = arith.constant 0 : i32
    return %c0_i32, %c0_i32_0 : i32, i32
  }
  func.func @transform_2(%arg0: i32) -> (i32, i32) {
    %c0_i32 = arith.constant 0 : i32
    %c0_i32_0 = arith.constant 0 : i32
    %c0_i32_1 = arith.constant 0 : i32
    return %c0_i32, %c0_i32_0 : i32, i32
  }
  func.func @transform_3(%arg0: i32) -> (i32, i32) {
    %c0_i32 = arith.constant 0 : i32
    %c0_i32_0 = arith.constant 0 : i32
    %c0_i32_1 = arith.constant 0 : i32
    return %c0_i32, %c0_i32_0 : i32, i32
  }
  func.func @transform_4(%arg0: i32) -> (i32, i32) {
    %c0_i32 = arith.constant 0 : i32
    %c0_i32_0 = arith.constant 0 : i32
    %c0_i32_1 = arith.constant 0 : i32
    return %c0_i32, %c0_i32_0 : i32, i32
  }
  func.func @transform_5(%arg0: i32) -> (i32, i32) {
    %c0_i32 = arith.constant 0 : i32
    %c0_i32_0 = arith.constant 0 : i32
    %c0_i32_1 = arith.constant 0 : i32
    return %c0_i32, %c0_i32_0 : i32, i32
  }
  func.func @transform_6(%arg0: i32) -> (i32, i32) {
    %c0_i32 = arith.constant 0 : i32
    %c0_i32_0 = arith.constant 0 : i32
    %c0_i32_1 = arith.constant 0 : i32
    return %c0_i32, %c0_i32_0 : i32, i32
  }
  func.func @transform_7(%arg0: i32) -> (i32, i32) {
    %c0_i32 = arith.constant 0 : i32
    %c0_i32_0 = arith.constant 0 : i32
    return %arg0, %c0_i32 : i32, i32
  }
}

</mosaic_0001>

<bundles_post_ra>
// kernel: classifier_head.1
= control target key start
LH: loop header
LB: loop body
LE: loop exit
PB: predicated region body
PF: predicated region fallthrough
CT: control target
= control target key end

     0   :  { %s2190_s1 = inlined_call_operand.vmem [shape: bf16[128,512], index: 1, kind: input, shape index: {}]   ;;  %s2191_s3 = inlined_call_operand.vmem [shape: bf16[512,256], index: 3, kind: input, shape index: {}]   ;;  %s2192_s0 = inlined_call_operand.vmem [shape: bf16[8,128], index: 0, kind: input, shape index: {}]   ;;  %s2193_s2 = inlined_call_operand.vmem [shape: f32[1,512], index: 2, kind: input, shape index: {}]   ;;  %s2194_s5 = inlined_call_operand.vmem [shape: bf16[256,128], index: 5, kind: input, shape index: {}]   ;;  %s2195_s6 = inlined_call_operand.vmem [shape: f32[1,128], index: 6, kind: input, shape index: {}]   ;;  %s2196_s4 = inlined_call_operand.vmem [shape: f32[1,256], index: 4, kind: input, shape index: {}]   ;;  %s2197_s7 = inlined_call_operand.vmem [shape: f32[8,128], index: 7, kind: output, shape index: {}]  }
   0x1   :  { %v1064_v0 = vld [vmem:[%s2190_s1 + $0xe0] sm:$0xf]  ;;  %v1428_v1 = vld [vmem:[%s2190_s1 + $0xec] sm:$0xf0]  ;;  %v1426_v2 = vld [vmem:[%s2190_s1 + $0xe4] sm:$0xf] }
   0x2   :  { %v1065_v3 = vor.u32 %v1428_v1, %v1064_v0  ;;  %v1066_v4 = vld [vmem:[%s2190_s1 + $0xf0] sm:$0xf0]  ;;  %v1072_v5 = vld [vmem:[%s2190_s1 + $0xe8] sm:$0xf]  ;;  %v1429_v6 = vld [vmem:[%s2190_s1 + $0xf4] sm:$0xf0] }
   0x3   :  { %v1069_v7 = vor.u32 %v1426_v2, %v1066_v4  ;;  %v1073_v8 = vor.u32 %v1429_v6, %v1072_v5  ;;  %v1427_v9 = vld [vmem:[%s2190_s1 + $0xec] sm:$0xf]  ;;  %v1074_v10 = vld [vmem:[%s2190_s1 + $0xf8] sm:$0xf0]  ;;  %v1048_v11 = vld [vmem:[%s2190_s1 + $0xc0] sm:$0xf] }
   0x4   :  { %229 = vmatpush.bf16.msra.mxu0 %v1065_v3  ;;  %v1077_v12 = vor.u32 %v1427_v9, %v1074_v10  ;;  %v1424_v13 = vld [vmem:[%s2190_s1 + $0xcc] sm:$0xf0]  ;;  %v1422_v14 = vld [vmem:[%s2190_s1 + $0xc4] sm:$0xf]  ;;  %v1050_v15 = vld [vmem:[%s2190_s1 + $0xd0] sm:$0xf0] }
   0x5   :  { %242 = vmatpush.bf16.msra.mxu1 %v1069_v7  ;;  %255 = vmatpush.bf16.msra.mxu2 %v1073_v8  ;;  %v1049_v16 = vor.u32 %v1424_v13, %v1048_v11  ;;  %v1053_v17 = vor.u32 %v1422_v14, %v1050_v15  ;;  %v1056_v18 = vld [vmem:[%s2190_s1 + $0xc8] sm:$0xf]  ;;  %v1425_v19 = vld [vmem:[%s2190_s1 + $0xd4] sm:$0xf0]  ;;  %v1423_v20 = vld [vmem:[%s2190_s1 + $0xcc] sm:$0xf] }
   0x6   :  { %268 = vmatpush.bf16.msra.mxu3 %v1077_v12  ;;  %v1057_v21 = vor.u32 %v1425_v19, %v1056_v18  ;;  %v1058_v22 = vld [vmem:[%s2190_s1 + $0xd8] sm:$0xf0]  ;;  %v1032_v23 = vld [vmem:[%s2190_s1 + $0xa0] sm:$0xf]  ;;  %v1420_v24 = vld [vmem:[%s2190_s1 + $0xac] sm:$0xf0] }
   0x7   :  { %v1061_v25 = vor.u32 %v1423_v20, %v1058_v22  ;;  %v1418_v26 = vld [vmem:[%s2190_s1 + $0xa4] sm:$0xf]  ;;  %v1034_v27 = vld [vmem:[%s2190_s1 + $0xb0] sm:$0xf0]  ;;  %v1040_v28 = vld [vmem:[%s2190_s1 + $0xa8] sm:$0xf]  ;;  %v1033_v29 = vor.u32 %v1420_v24, %v1032_v23 }
   0x8   :  { %230 = vmatpush.bf16.msra.mxu0 %v1049_v16  ;;  %v1421_v30 = vld [vmem:[%s2190_s1 + $0xb4] sm:$0xf0]  ;;  %v1419_v31 = vld [vmem:[%s2190_s1 + $0xac] sm:$0xf]  ;;  %v1042_v32 = vld [vmem:[%s2190_s1 + $0xb8] sm:$0xf0]  ;;  %v1037_v33 = vor.u32 %v1418_v26, %v1034_v27 }
   0x9   :  { %243 = vmatpush.bf16.msra.mxu1 %v1053_v17  ;;  %256 = vmatpush.bf16.msra.mxu2 %v1057_v21  ;;  %v1041_v34 = vor.u32 %v1421_v30, %v1040_v28  ;;  %v1016_v35 = vld [vmem:[%s2190_s1 + $0x80] sm:$0xf]  ;;  %v1416_v36 = vld [vmem:[%s2190_s1 + $0x8c] sm:$0xf0]  ;;  %v1414_v37 = vld [vmem:[%s2190_s1 + $0x84] sm:$0xf]  ;;  %v1045_v38 = vor.u32 %v1419_v31, %v1042_v32 }
   0xa   :  { %269 = vmatpush.bf16.msra.mxu3 %v1061_v25  ;;  %v1018_v39 = vld [vmem:[%s2190_s1 + $0x90] sm:$0xf0]  ;;  %v1024_v40 = vld [vmem:[%s2190_s1 + $0x88] sm:$0xf]  ;;  %v1417_v41 = vld [vmem:[%s2190_s1 + $0x94] sm:$0xf0]  ;;  %v1017_v44 = vor.u32 %v1416_v36, %v1016_v35 }
   0xb   :  { %v1415_v42 = vld [vmem:[%s2190_s1 + $0x8c] sm:$0xf]  ;;  %v1026_v43 = vld [vmem:[%s2190_s1 + $0x98] sm:$0xf0]  ;;  %v1021_v45 = vor.u32 %v1414_v37, %v1018_v39  ;;  %v1025_v46 = vor.u32 %v1417_v41, %v1024_v40  ;;  %v1000_v47 = vld [vmem:[%s2190_s1 + $0x60] sm:$0xf] }
   0xc   :  { %231 = vmatpush.bf16.msra.mxu0 %v1033_v29  ;;  %v1412_v48 = vld [vmem:[%s2190_s1 + $0x6c] sm:$0xf0]  ;;  %v1410_v49 = vld [vmem:[%s2190_s1 + $0x64] sm:$0xf]  ;;  %v1029_v50 = vor.u32 %v1415_v42, %v1026_v43  ;;  %v1002_v51 = vld [vmem:[%s2190_s1 + $0x70] sm:$0xf0] }
   0xd   :  { %244 = vmatpush.bf16.msra.mxu1 %v1037_v33  ;;  %257 = vmatpush.bf16.msra.mxu2 %v1041_v34  ;;  %v1008_v52 = vld [vmem:[%s2190_s1 + $0x68] sm:$0xf]  ;;  %v1413_v53 = vld [vmem:[%s2190_s1 + $0x74] sm:$0xf0]  ;;  %v1411_v54 = vld [vmem:[%s2190_s1 + $0x6c] sm:$0xf]  ;;  %v1001_v56 = vor.u32 %v1412_v48, %v1000_v47  ;;  %v1005_v57 = vor.u32 %v1410_v49, %v1002_v51 }
   0xe   :  { %270 = vmatpush.bf16.msra.mxu3 %v1045_v38  ;;  %v1010_v55 = vld [vmem:[%s2190_s1 + $0x78] sm:$0xf0]  ;;  %v1009_v58 = vor.u32 %v1413_v53, %v1008_v52  ;;  %v984_v59 = vld [vmem:[%s2190_s1 + $0x40] sm:$0xf]  ;;  %v1408_v60 = vld [vmem:[%s2190_s1 + $0x4c] sm:$0xf0] }
   0xf   :  { %v1406_v61 = vld [vmem:[%s2190_s1 + $0x44] sm:$0xf]  ;;  %v1013_v62 = vor.u32 %v1411_v54, %v1010_v55  ;;  %v986_v63 = vld [vmem:[%s2190_s1 + $0x50] sm:$0xf0]  ;;  %v992_v0 = vld [vmem:[%s2190_s1 + $0x48] sm:$0xf]  ;;  %v985_v4 = vor.u32 %v1408_v60, %v984_v59 }
  0x10   :  { %232 = vmatpush.bf16.msra.mxu0 %v1017_v44  ;;  %v1409_v1 = vld [vmem:[%s2190_s1 + $0x54] sm:$0xf0]  ;;  %v1407_v2 = vld [vmem:[%s2190_s1 + $0x4c] sm:$0xf]  ;;  %v994_v3 = vld [vmem:[%s2190_s1 + $0x58] sm:$0xf0]  ;;  %v989_v5 = vor.u32 %v1406_v61, %v986_v63 }
  0x11   :  { %245 = vmatpush.bf16.msra.mxu1 %v1021_v45  ;;  %258 = vmatpush.bf16.msra.mxu2 %v1025_v46  ;;  %v993_v6 = vor.u32 %v1409_v1, %v992_v0  ;;  %v968_v7 = vld [vmem:[%s2190_s1 + $0x20] sm:$0xf]  ;;  %v1404_v8 = vld [vmem:[%s2190_s1 + $0x2c] sm:$0xf0]  ;;  %v1402_v9 = vld [vmem:[%s2190_s1 + $0x24] sm:$0xf]  ;;  %v997_v10 = vor.u32 %v1407_v2, %v994_v3 }
  0x12   :  { %271 = vmatpush.bf16.msra.mxu3 %v1029_v50  ;;  %v970_v11 = vld [vmem:[%s2190_s1 + $0x30] sm:$0xf0]  ;;  %v976_v12 = vld [vmem:[%s2190_s1 + $0x28] sm:$0xf]  ;;  %v1405_v13 = vld [vmem:[%s2190_s1 + $0x34] sm:$0xf0]  ;;  %v969_v16 = vor.u32 %v1404_v8, %v968_v7 }
  0x13   :  { %v1403_v14 = vld [vmem:[%s2190_s1 + $0x2c] sm:$0xf]  ;;  %v978_v15 = vld [vmem:[%s2190_s1 + $0x38] sm:$0xf0]  ;;  %v952_v17 = vld [vmem:[%s2190_s1] sm:$0xf]  ;;  %v973_v18 = vor.u32 %v1402_v9, %v970_v11  ;;  %v977_v19 = vor.u32 %v1405_v13, %v976_v12 }
  0x14   :  { %233 = vmatpush.bf16.msra.mxu0 %v1001_v56  ;;  %v1400_v20 = vld [vmem:[%s2190_s1 + $0xc] sm:$0xf0]  ;;  %v1398_v21 = vld [vmem:[%s2190_s1 + $0x4] sm:$0xf]  ;;  %v954_v22 = vld [vmem:[%s2190_s1 + $0x10] sm:$0xf0]  ;;  %v981_v23 = vor.u32 %v1403_v14, %v978_v15 }
  0x15   :  { %246 = vmatpush.bf16.msra.mxu1 %v1005_v57  ;;  %259 = vmatpush.bf16.msra.mxu2 %v1009_v58  ;;  %v960_v24 = vld [vmem:[%s2190_s1 + $0x8] sm:$0xf]  ;;  %v1401_v25 = vld [vmem:[%s2190_s1 + $0x14] sm:$0xf0]  ;;  %v1399_v26 = vld [vmem:[%s2190_s1 + $0xc] sm:$0xf]  ;;  %v953_v30 = vor.u32 %v1400_v20, %v952_v17  ;;  %v957_v33 = vor.u32 %v1398_v21, %v954_v22 }
  0x16   :  { %272 = vmatpush.bf16.msra.mxu3 %v1013_v62  ;;  %v962_v27 = vld [vmem:[%s2190_s1 + $0x18] sm:$0xf0]  ;;  %v1136_v28 = vld [vmem:[%s2191_s3 + $0x70] sm:$0xf]  ;;  %v1445_v29 = vld [vmem:[%s2191_s3 + $0x74] sm:$0xf0]  ;;  %v961_v34 = vor.u32 %v1401_v25, %v960_v24 }
  0x17   :  { %v1200_v31 = vld [vmem:[%s2191_s3 + $0xf0] sm:$0xf]  ;;  %v1461_v32 = vld [vmem:[%s2191_s3 + $0xf4] sm:$0xf0]  ;;  %v965_v35 = vor.u32 %v1399_v26, %v962_v27  ;;  %v1137_v36 = vor.u32 %v1445_v29, %v1136_v28  ;;  %v1128_v37 = vld [vmem:[%s2191_s3 + $0x60] sm:$0xf] }
  0x18   :  { %234 = vmatpush.bf16.msra.mxu0 %v985_v4  ;;  %v1264_v38 = vld [vmem:[%s2191_s3 + $0x170] sm:$0xf]  ;;  %v1477_v39 = vld [vmem:[%s2191_s3 + $0x174] sm:$0xf0]  ;;  %v1201_v40 = vor.u32 %v1461_v32, %v1200_v31  ;;  %v1443_v41 = vld [vmem:[%s2191_s3 + $0x64] sm:$0xf0] }
  0x19   :  { %247 = vmatpush.bf16.msra.mxu1 %v989_v5  ;;  %260 = vmatpush.bf16.msra.mxu2 %v993_v6  ;;  %v1328_v42 = vld [vmem:[%s2191_s3 + $0x1f0] sm:$0xf]  ;;  %v1493_v43 = vld [vmem:[%s2191_s3 + $0x1f4] sm:$0xf0]  ;;  %v26_v44 = vld [vmem:[%s2192_s0] sm:$0xf]  ;;  %v1265_v47 = vor.u32 %v1477_v39, %v1264_v38  ;;  %v1129_v48 = vor.u32 %v1443_v41, %v1128_v37 }
  0x1a   :  { %273 = vmatpush.bf16.msra.mxu3 %v997_v10  ;;  %v1192_v45 = vld [vmem:[%s2191_s3 + $0xe0] sm:$0xf]  ;;  %v1459_v46 = vld [vmem:[%s2191_s3 + $0xe4] sm:$0xf0]  ;;  %v1329_v49 = vor.u32 %v1493_v43, %v1328_v42  ;;  %v1120_v50 = vld [vmem:[%s2191_s3 + $0x50] sm:$0xf] }
  0x1b   :  { %v1256_v51 = vld [vmem:[%s2191_s3 + $0x160] sm:$0xf]  ;;  %v1475_v52 = vld [vmem:[%s2191_s3 + $0x164] sm:$0xf0]  ;;  %v1193_v53 = vor.u32 %v1459_v46, %v1192_v45  ;;  %v1441_v54 = vld [vmem:[%s2191_s3 + $0x54] sm:$0xf0] }
  0x1c   :  { %235 = vmatpush.bf16.msra.mxu0 %v969_v16  ;;  %v1320_v55 = vld [vmem:[%s2191_s3 + $0x1e0] sm:$0xf]  ;;  %v1491_v56 = vld [vmem:[%s2191_s3 + $0x1e4] sm:$0xf0]  ;;  %v1184_v57 = vld [vmem:[%s2191_s3 + $0xd0] sm:$0xf]  ;;  %v1257_v59 = vor.u32 %v1475_v52, %v1256_v51  ;;  %v1121_v60 = vor.u32 %v1441_v54, %v1120_v50 }
  0x1d   :  { %248 = vmatpush.bf16.msra.mxu1 %v973_v18  ;;  %261 = vmatpush.bf16.msra.mxu2 %v977_v19  ;;  %v1457_v58 = vld [vmem:[%s2191_s3 + $0xd4] sm:$0xf0]  ;;  %v1321_v61 = vor.u32 %v1491_v56, %v1320_v55  ;;  %v1112_v62 = vld [vmem:[%s2191_s3 + $0x40] sm:$0xf]  ;;  %v1248_v63 = vld [vmem:[%s2191_s3 + $0x150] sm:$0xf] }
  0x1e   :  { %274 = vmatpush.bf16.msra.mxu3 %v981_v23  ;;  %v1473_v0 = vld [vmem:[%s2191_s3 + $0x154] sm:$0xf0]  ;;  %v1185_v1 = vor.u32 %v1457_v58, %v1184_v57  ;;  %v1439_v2 = vld [vmem:[%s2191_s3 + $0x44] sm:$0xf0]  ;;  %v1312_v3 = vld [vmem:[%s2191_s3 + $0x1d0] sm:$0xf] }
  0x1f   :  { %v1489_v4 = vld [vmem:[%s2191_s3 + $0x1d4] sm:$0xf0]  ;;  %v1176_v5 = vld [vmem:[%s2191_s3 + $0xc0] sm:$0xf]  ;;  %v1455_v6 = vld [vmem:[%s2191_s3 + $0xc4] sm:$0xf0]  ;;  %v1249_v7 = vor.u32 %v1473_v0, %v1248_v63  ;;  %v1113_v8 = vor.u32 %v1439_v2, %v1112_v62 }
  0x20   :  { %236 = vmatpush.bf16.msra.mxu0 %v953_v30  ;;  %v1313_v9 = vor.u32 %v1489_v4, %v1312_v3  ;;  %v1104_v10 = vld [vmem:[%s2191_s3 + $0x30] sm:$0xf]  ;;  %v1240_v11 = vld [vmem:[%s2191_s3 + $0x140] sm:$0xf]  ;;  %v1471_v12 = vld [vmem:[%s2191_s3 + $0x144] sm:$0xf0]  ;;  %v1177_v13 = vor.u32 %v1455_v6, %v1176_v5 }
  0x21   :  { %249 = vmatpush.bf16.msra.mxu1 %v957_v33  ;;  %262 = vmatpush.bf16.msra.mxu2 %v961_v34  ;;  %v1437_v14 = vld [vmem:[%s2191_s3 + $0x34] sm:$0xf0]  ;;  %v1304_v15 = vld [vmem:[%s2191_s3 + $0x1c0] sm:$0xf]  ;;  %v1487_v16 = vld [vmem:[%s2191_s3 + $0x1c4] sm:$0xf0]  ;;  %v1241_v19 = vor.u32 %v1471_v12, %v1240_v11 }
  0x22   :  { %275 = vmatpush.bf16.msra.mxu3 %v965_v35  ;;  %v1168_v17 = vld [vmem:[%s2191_s3 + $0xb0] sm:$0xf]  ;;  %v1453_v18 = vld [vmem:[%s2191_s3 + $0xb4] sm:$0xf0]  ;;  %v1105_v20 = vor.u32 %v1437_v14, %v1104_v10  ;;  %v1305_v21 = vor.u32 %v1487_v16, %v1304_v15  ;;  %v1096_v22 = vld [vmem:[%s2191_s3 + $0x20] sm:$0xf] }
  0x23   :  { %237 = vmatmul.bf16.vlgmr.msra.gmra.mxu0 %v26_v44  ;;  %v1232_v23 = vld [vmem:[%s2191_s3 + $0x130] sm:$0xf]  ;;  %v1469_v24 = vld [vmem:[%s2191_s3 + $0x134] sm:$0xf0]  ;;  %v1169_v25 = vor.u32 %v1453_v18, %v1168_v17  ;;  %v1435_v26 = vld [vmem:[%s2191_s3 + $0x24] sm:$0xf0] }
  0x24   :  { %679 = vmatpush.bf16.msrb.mxu0 %v1137_v36  ;;  %250 = vmatmul.bf16.vlgmr.msra.gmra.mxu1 %v26_v44  ;;  %v1296_v27 = vld [vmem:[%s2191_s3 + $0x1b0] sm:$0xf]  ;;  %v1485_v28 = vld [vmem:[%s2191_s3 + $0x1b4] sm:$0xf0]  ;;  %v1160_v29 = vld [vmem:[%s2191_s3 + $0xa0] sm:$0xf]  ;;  %v1233_v31 = vor.u32 %v1469_v24, %v1232_v23  ;;  %v1097_v32 = vor.u32 %v1435_v26, %v1096_v22 }
  0x25   :  { %692 = vmatpush.bf16.msrb.mxu1 %v1201_v40  ;;  %263 = vmatmul.bf16.vlgmr.msra.gmra.mxu2 %v26_v44  ;;  %v1451_v30 = vld [vmem:[%s2191_s3 + $0xa4] sm:$0xf0]  ;;  %v1297_v33 = vor.u32 %v1485_v28, %v1296_v27  ;;  %v1088_v34 = vld [vmem:[%s2191_s3 + $0x10] sm:$0xf]  ;;  %v1224_v35 = vld [vmem:[%s2191_s3 + $0x120] sm:$0xf] }
  0x26   :  { %276 = vmatmul.bf16.vlgmr.msra.gmra.mxu3 %v26_v44  ;;  %705 = vmatpush.bf16.msrb.mxu2 %v1265_v47  ;;  %v1467_v36 = vld [vmem:[%s2191_s3 + $0x124] sm:$0xf0]  ;;  %v1161_v37 = vor.u32 %v1451_v30, %v1160_v29  ;;  %v1433_v38 = vld [vmem:[%s2191_s3 + $0x14] sm:$0xf0]  ;;  %v1288_v39 = vld [vmem:[%s2191_s3 + $0x1a0] sm:$0xf] }
  0x27   :  { %718 = vmatpush.bf16.msrb.mxu3 %v1329_v49  ;;  %v1483_v40 = vld [vmem:[%s2191_s3 + $0x1a4] sm:$0xf0]  ;;  %v1152_v41 = vld [vmem:[%s2191_s3 + $0x90] sm:$0xf]  ;;  %v1449_v42 = vld [vmem:[%s2191_s3 + $0x94] sm:$0xf0]  ;;  %v1225_v43 = vor.u32 %v1467_v36, %v1224_v35  ;;  %v1089_v45 = vor.u32 %v1433_v38, %v1088_v34 }
  0x28   :  { %680 = vmatpush.bf16.msrb.mxu0 %v1129_v48  ;;  %v1080_v44 = vld [vmem:[%s2191_s3] sm:$0xf]  ;;  %v1289_v46 = vor.u32 %v1483_v40, %v1288_v39  ;;  %v1431_v47 = vld [vmem:[%s2191_s3 + $0x4] sm:$0xf0]  ;;  %v1216_v48 = vld [vmem:[%s2191_s3 + $0x110] sm:$0xf]  ;;  %v1153_v50 = vor.u32 %v1449_v42, %v1152_v41 }
  0x29   :  { %693 = vmatpush.bf16.msrb.mxu1 %v1193_v53  ;;  %v1465_v49 = vld [vmem:[%s2191_s3 + $0x114] sm:$0xf0]  ;;  %v1144_v51 = vld [vmem:[%s2191_s3 + $0x80] sm:$0xf]  ;;  %v1280_v52 = vld [vmem:[%s2191_s3 + $0x190] sm:$0xf] }
  0x2a   :  { %706 = vmatpush.bf16.msrb.mxu2 %v1257_v59  ;;  %v1481_v53 = vld [vmem:[%s2191_s3 + $0x194] sm:$0xf0]  ;;  %v1447_v54 = vld [vmem:[%s2191_s3 + $0x84] sm:$0xf0]  ;;  %v1444_v55 = vld [vmem:[%s2191_s3 + $0x74] sm:$0xf]  ;;  %v1217_v59 = vor.u32 %v1465_v49, %v1216_v48 }
  0x2b   :  { %719 = vmatpush.bf16.msrb.mxu3 %v1321_v61  ;;  %v1138_v56 = vld [vmem:[%s2191_s3 + $0x78] sm:$0xf0]  ;;  %v1460_v57 = vld [vmem:[%s2191_s3 + $0xf4] sm:$0xf]  ;;  %v1281_v61 = vor.u32 %v1481_v53, %v1280_v52  ;;  %v1442_v62 = vld [vmem:[%s2191_s3 + $0x64] sm:$0xf]  ;;  %v1145_v2 = vor.u32 %v1447_v54, %v1144_v51 }
  0x2c   :  { %681 = vmatpush.bf16.msrb.mxu0 %v1121_v60  ;;  %v1202_v58 = vld [vmem:[%s2191_s3 + $0xf8] sm:$0xf0]  ;;  %v1081_v60 = vor.u32 %v1431_v47, %v1080_v44  ;;  %v1208_v63 = vld [vmem:[%s2191_s3 + $0x100] sm:$0xf]  ;;  %v1463_v0 = vld [vmem:[%s2191_s3 + $0x104] sm:$0xf0]  ;;  %v1141_v3 = vor.u32 %v1444_v55, %v1138_v56 }
  0x2d   :  { %694 = vmatpush.bf16.msrb.mxu1 %v1185_v1  ;;  %v1272_v1 = vld [vmem:[%s2191_s3 + $0x180] sm:$0xf]  ;;  %v1479_v4 = vld [vmem:[%s2191_s3 + $0x184] sm:$0xf0]  ;;  %v1476_v5 = vld [vmem:[%s2191_s3 + $0x174] sm:$0xf] }
  0x2e   :  { %707 = vmatpush.bf16.msrb.mxu2 %v1249_v7  ;;  %v1266_v6 = vld [vmem:[%s2191_s3 + $0x178] sm:$0xf0]  ;;  %v1205_v7 = vor.u32 %v1460_v57, %v1202_v58  ;;  %v1458_v11 = vld [vmem:[%s2191_s3 + $0xe4] sm:$0xf]  ;;  %v1194_v12 = vld [vmem:[%s2191_s3 + $0xe8] sm:$0xf0]  ;;  %v1273_v14 = vor.u32 %v1479_v4, %v1272_v1 }
  0x2f   :  { %720 = vmatpush.bf16.msrb.mxu3 %v1313_v9  ;;  %v1492_v9 = vld [vmem:[%s2191_s3 + $0x1f4] sm:$0xf]  ;;  %v1330_v10 = vld [vmem:[%s2191_s3 + $0x1f8] sm:$0xf0]  ;;  %v1269_v15 = vor.u32 %v1476_v5, %v1266_v6  ;;  %v1197_v18 = vor.u32 %v1458_v11, %v1194_v12  ;;  %v1258_v26 = vld [vmem:[%s2191_s3 + $0x168] sm:$0xf0] }
  0x30   :  { %682 = vmatpush.bf16.msrb.mxu0 %v1113_v8  ;;  %v1130_v8 = vld [vmem:[%s2191_s3 + $0x68] sm:$0xf0]  ;;  %v1333_v17 = vor.u32 %v1492_v9, %v1330_v10  ;;  %v1186_v23 = vld [vmem:[%s2191_s3 + $0xd8] sm:$0xf0]  ;;  %v1490_v28 = vld [vmem:[%s2191_s3 + $0x1e4] sm:$0xf] }
  0x31   :  { %695 = vmatpush.bf16.msrb.mxu1 %v1177_v13  ;;  %v1209_v13 = vor.u32 %v1463_v0, %v1208_v63  ;;  %v1133_v16 = vor.u32 %v1442_v62, %v1130_v8  ;;  %v1322_v29 = vld [vmem:[%s2191_s3 + $0x1e8] sm:$0xf0]  ;;  %v1250_v38 = vld [vmem:[%s2191_s3 + $0x158] sm:$0xf0]  ;;  %v1488_v39 = vld [vmem:[%s2191_s3 + $0x1d4] sm:$0xf] }
  0x32   :  { %708 = vmatpush.bf16.msrb.mxu2 %v1241_v19  ;;  %v1440_v19 = vld [vmem:[%s2191_s3 + $0x54] sm:$0xf]  ;;  %v1325_v30 = vor.u32 %v1490_v28, %v1322_v29  ;;  %v1178_v35 = vld [vmem:[%s2191_s3 + $0xc8] sm:$0xf0]  ;;  %v1314_v41 = vld [vmem:[%s2191_s3 + $0x1d8] sm:$0xf0] }
  0x33   :  { %721 = vmatpush.bf16.msrb.mxu3 %v1305_v21  ;;  %v1456_v21 = vld [vmem:[%s2191_s3 + $0xd4] sm:$0xf]  ;;  %v1317_v42 = vor.u32 %v1488_v39, %v1314_v41  ;;  %v1106_v44 = vld [vmem:[%s2191_s3 + $0x38] sm:$0xf0]  ;;  %v1470_v49 = vld [vmem:[%s2191_s3 + $0x144] sm:$0xf] }
  0x34   :  { %683 = vmatpush.bf16.msrb.mxu0 %v1105_v20  ;;  %v1122_v20 = vld [vmem:[%s2191_s3 + $0x58] sm:$0xf0]  ;;  %v1189_v24 = vor.u32 %v1456_v21, %v1186_v23  ;;  %v1486_v51 = vld [vmem:[%s2191_s3 + $0x1c4] sm:$0xf]  ;;  %v1306_v53 = vld [vmem:[%s2191_s3 + $0x1c8] sm:$0xf0] }
  0x35   :  { %696 = vmatpush.bf16.msrb.mxu1 %v1169_v25  ;;  %v1125_v22 = vor.u32 %v1440_v19, %v1122_v20  ;;  %v1474_v25 = vld [vmem:[%s2191_s3 + $0x164] sm:$0xf]  ;;  %v1170_v47 = vld [vmem:[%s2191_s3 + $0xb8] sm:$0xf0]  ;;  %v1309_v54 = vor.u32 %v1486_v51, %v1306_v53  ;;  %v1098_v56 = vld [vmem:[%s2191_s3 + $0x28] sm:$0xf0] }
  0x36   :  { %709 = vmatpush.bf16.msrb.mxu2 %v1233_v31  ;;  %v1261_v27 = vor.u32 %v1474_v25, %v1258_v26  ;;  %v1438_v31 = vld [vmem:[%s2191_s3 + $0x44] sm:$0xf]  ;;  %v1234_v62 = vld [vmem:[%s2191_s3 + $0x138] sm:$0xf0]  ;;  %v1484_v63 = vld [vmem:[%s2191_s3 + $0x1b4] sm:$0xf] }
  0x37   :  { %722 = vmatpush.bf16.msrb.mxu3 %v1297_v33  ;;  %v1454_v33 = vld [vmem:[%s2191_s3 + $0xc4] sm:$0xf]  ;;  %v1298_v1 = vld [vmem:[%s2191_s3 + $0x1b8] sm:$0xf0]  ;;  %v1448_v5 = vld [vmem:[%s2191_s3 + $0x94] sm:$0xf] }
  0x38   :  { %684 = vmatpush.bf16.msrb.mxu0 %v1097_v32  ;;  %v1114_v32 = vld [vmem:[%s2191_s3 + $0x48] sm:$0xf0]  ;;  %v1181_v36 = vor.u32 %v1454_v33, %v1178_v35  ;;  %v1434_v55 = vld [vmem:[%s2191_s3 + $0x24] sm:$0xf]  ;;  %v1090_v4 = vld [vmem:[%s2191_s3 + $0x18] sm:$0xf0] }
  0x39   :  { %697 = vmatpush.bf16.msrb.mxu1 %v1161_v37  ;;  %v1117_v34 = vor.u32 %v1438_v31, %v1114_v32  ;;  %v1472_v37 = vld [vmem:[%s2191_s3 + $0x154] sm:$0xf]  ;;  %v1450_v57 = vld [vmem:[%s2191_s3 + $0xa4] sm:$0xf]  ;;  %v1101_v58 = vor.u32 %v1434_v55, %v1098_v56  ;;  %v1226_v9 = vld [vmem:[%s2191_s3 + $0x128] sm:$0xf0] }
  0x3a   :  { %710 = vmatpush.bf16.msrb.mxu2 %v1225_v43  ;;  %v1253_v40 = vor.u32 %v1472_v37, %v1250_v38  ;;  %v1436_v43 = vld [vmem:[%s2191_s3 + $0x34] sm:$0xf]  ;;  %v1466_v8 = vld [vmem:[%s2191_s3 + $0x124] sm:$0xf]  ;;  %v1282_v25 = vld [vmem:[%s2191_s3 + $0x198] sm:$0xf0] }
  0x3b   :  { %723 = vmatpush.bf16.msrb.mxu3 %v1289_v46  ;;  %v1452_v46 = vld [vmem:[%s2191_s3 + $0xb4] sm:$0xf]  ;;  %v1229_v11 = vor.u32 %v1466_v8, %v1226_v9  ;;  %v1482_v12 = vld [vmem:[%s2191_s3 + $0x1a4] sm:$0xf]  ;;  %v1210_v28 = vld [vmem:[%s2191_s3 + $0x108] sm:$0xf0] }
  0x3c   :  { %685 = vmatpush.bf16.msrb.mxu0 %v1089_v45  ;;  %v1109_v45 = vor.u32 %v1436_v43, %v1106_v44  ;;  %v1173_v48 = vor.u32 %v1452_v46, %v1170_v47  ;;  %v1464_v21 = vld [vmem:[%s2191_s3 + $0x114] sm:$0xf]  ;;  %v1478_v29 = vld [vmem:[%s2191_s3 + $0x184] sm:$0xf]  ;;  %v1274_v31 = vld [vmem:[%s2191_s3 + $0x188] sm:$0xf0] }
  0x3d   :  { %698 = vmatpush.bf16.msrb.mxu1 %v1153_v50  ;;  %v1242_v50 = vld [vmem:[%s2191_s3 + $0x148] sm:$0xf0]  ;;  %v1480_v23 = vld [vmem:[%s2191_s3 + $0x194] sm:$0xf]  ;;  %v59_v32 = vld [vmem:[%s2193_s2] sm:$0xf]  ;;  %v1277_v33 = vor.u32 %v1478_v29, %v1274_v31 }
  0x3e   :  { %711 = vmatpush.bf16.msrb.mxu2 %v1217_v59  ;;  %v1245_v52 = vor.u32 %v1470_v49, %v1242_v50  ;;  %v1162_v59 = vld [vmem:[%s2191_s3 + $0xa8] sm:$0xf0]  ;;  %v1285_v26 = vor.u32 %v1480_v23, %v1282_v25  ;;  %v62_v35 = vperm.slane %v59_v32, 1  ;;  %v1501_v43 = vld [vmem:[%s2194_s5 + $0x38] sm:$0xff]  ;;  %v1500_v51 = vld [vmem:[%s2194_s5 + $0x30] sm:$0xff] }
  0x3f   :  { %724 = vmatpush.bf16.msrb.mxu3 %v1281_v61  ;;  %v1468_v61 = vld [vmem:[%s2191_s3 + $0x134] sm:$0xf]  ;;  %v1503_v8 = vld [vmem:[%s2194_s5 + $0x48] sm:$0xff]  ;;  %v353_v9 = vld [vmem:[%s2196_s4] sm:$0x3] }
  0x40   :  { %686 = vmatpush.bf16.msrb.mxu0 %v1081_v60  ;;  %v1165_v60 = vor.u32 %v1450_v57, %v1162_v59  ;;  %v1237_v0 = vor.u32 %v1468_v61, %v1234_v62  ;;  %v1499_v57 = vld [vmem:[%s2194_s5 + $0x28] sm:$0xff]  ;;  %v1498_v61 = vld [vmem:[%s2194_s5 + $0x20] sm:$0xff]  ;;  %v1509_v62 = vld [vmem:[%s2194_s5 + $0x78] sm:$0xff] }
  0x41   :  { %699 = vmatpush.bf16.msrb.mxu1 %v1145_v2  ;;  %v1301_v2 = vor.u32 %v1484_v63, %v1298_v1  ;;  %v1497_v63 = vld [vmem:[%s2194_s5 + $0x18] sm:$0xff]  ;;  %v1508_v1 = vld [vmem:[%s2194_s5 + $0x70] sm:$0xff] }
  0x42   :  { %712 = vmatpush.bf16.msrb.mxu2 %v1209_v13  ;;  %v1290_v13 = vld [vmem:[%s2191_s3 + $0x1a8] sm:$0xf0] }
  0x43   :  { %725 = vmatpush.bf16.msrb.mxu3 %v1273_v14  ;;  %v1430_v14 = vld [vmem:[%s2191_s3 + $0x4] sm:$0xf] }
  0x44   :  { %731 = vmatpush.bf16.msra.mxu0 %v1141_v3  ;;  %v1432_v3 = vld [vmem:[%s2191_s3 + $0x14] sm:$0xf] }
  0x45   :  { %744 = vmatpush.bf16.msra.mxu1 %v1205_v7  ;;  %v1093_v6 = vor.u32 %v1432_v3, %v1090_v4  ;;  %v1154_v7 = vld [vmem:[%s2191_s3 + $0x98] sm:$0xf0]  ;;  %v1507_v3 = vld [vmem:[%s2194_s5 + $0x68] sm:$0xff]  ;;  %v1494_v4 = vld [vmem:[%s2194_s5] sm:$0xff] }
  0x46   :  { %757 = vmatpush.bf16.msra.mxu2 %v1269_v15  ;;  %v1157_v10 = vor.u32 %v1448_v5, %v1154_v7  ;;  %v1293_v15 = vor.u32 %v1482_v12, %v1290_v13  ;;  %v1506_v5 = vld [vmem:[%s2194_s5 + $0x60] sm:$0xff]  ;;  %v1504_v7 = vld [vmem:[%s2194_s5 + $0x50] sm:$0xff]  ;;  %v355_v12 = vperm.slane %v353_v9, 0 }
  0x47   :  { %770 = vmatpush.bf16.msra.mxu3 %v1333_v17  ;;  %v1446_v17 = vld [vmem:[%s2191_s3 + $0x84] sm:$0xf] }
  0x48   :  { %732 = vmatpush.bf16.msra.mxu0 %v1133_v16  ;;  %v1082_v16 = vld [vmem:[%s2191_s3 + $0x8] sm:$0xf0]  ;;  %v1502_v13 = vld [vmem:[%s2194_s5 + $0x40] sm:$0xff] }
  0x49   :  { %745 = vmatpush.bf16.msra.mxu1 %v1197_v18  ;;  %v1146_v18 = vld [vmem:[%s2191_s3 + $0x88] sm:$0xf0]  ;;  %v1085_v19 = vor.u32 %v1430_v14, %v1082_v16 }
  0x4a   :  { %758 = vmatpush.bf16.msra.mxu2 %v1261_v27  ;;  %v1149_v20 = vor.u32 %v1446_v17, %v1146_v18  ;;  %v1462_v27 = vld [vmem:[%s2191_s3 + $0x104] sm:$0xf] }
  0x4b   :  { %771 = vmatpush.bf16.msra.mxu3 %v1325_v30  ;;  %v1213_v30 = vor.u32 %v1462_v27, %v1210_v28 }
  0x4c   :  { %733 = vmatpush.bf16.msra.mxu0 %v1125_v22  ;;  %v1218_v22 = vld [vmem:[%s2191_s3 + $0x118] sm:$0xf0] }
  0x4d   :  { %746 = vmatpush.bf16.msra.mxu1 %v1189_v24  ;;  %v1221_v24 = vor.u32 %v1464_v21, %v1218_v22 }
  0x4e   :  { %759 = vmatpush.bf16.msra.mxu2 %v1253_v40 }
  0x4f   :  { %772 = vmatpush.bf16.msra.mxu3 %v1317_v42  ;;  %v63_v42 = vperm.slane %v59_v32, 2 }
  0x50   :  { %734 = vmatpush.bf16.msra.mxu0 %v1117_v34  ;;  %v61_v34 = vperm.slane %v59_v32, 0 }
  0x51   :  { %747 = vmatpush.bf16.msra.mxu1 %v1181_v36 }
  0x52   :  { %760 = vmatpush.bf16.msra.mxu2 %v1245_v52 }
  0x53   :  { %773 = vmatpush.bf16.msra.mxu3 %v1309_v54 }
  0x54   :  { %735 = vmatpush.bf16.msra.mxu0 %v1109_v45  ;;  %v64_v45 = vperm.slane %v59_v32, 3 }
  0x55   :  { %748 = vmatpush.bf16.msra.mxu1 %v1173_v48 }
  0x56   :  { %761 = vmatpush.bf16.msra.mxu2 %v1237_v0  ;;  %v1496_v0 = vld [vmem:[%s2194_s5 + $0x10] sm:$0xff] }
  0x57   :  { %774 = vmatpush.bf16.msra.mxu3 %v1301_v2  ;;  %v1495_v2 = vld [vmem:[%s2194_s5 + $0x8] sm:$0xff] }
  0x58   :  { %736 = vmatpush.bf16.msra.mxu0 %v1101_v58 }
  0x59   :  { %749 = vmatpush.bf16.msra.mxu1 %v1165_v60 }
  0x5a   :  { %762 = vmatpush.bf16.msra.mxu2 %v1229_v11 }
  0x5b   :  { %775 = vmatpush.bf16.msra.mxu3 %v1293_v15 }
  0x5c   :  { %737 = vmatpush.bf16.msra.mxu0 %v1093_v6  ;;  %v1505_v6 = vld [vmem:[%s2194_s5 + $0x58] sm:$0xff] }
  0x5d   :  { %750 = vmatpush.bf16.msra.mxu1 %v1157_v10 }
  0x5e   :  { %763 = vmatpush.bf16.msra.mxu2 %v1221_v24 }
  0x5f   :  { %776 = vmatpush.bf16.msra.mxu3 %v1285_v26  ;;  %v356_v26 = vperm.slane %v353_v9, 1 }
  0x60   :  { %738 = vmatpush.bf16.msra.mxu0 %v1085_v19 }
  0x61   :  { %751 = vmatpush.bf16.msra.mxu1 %v1149_v20 }
  0x62   :  { %764 = vmatpush.bf16.msra.mxu2 %v1213_v30 }
  0x63   :  { %777 = vmatpush.bf16.msra.mxu3 %v1277_v33 }
  0xa0   :  { %v238_v36 = vpop.f32.mrf.mxu0 }
  0xa1   :  { %v239_v37 = vadd.f32 %v238_v36, %v61_v34  ;;  %v251_v38 = vpop.f32.mrf.mxu1 }
  0xa2   :  { %v252_v39 = vadd.f32 %v251_v38, %v62_v35 }
  0xa3   :  { %v281_v40 = vmax.f32 %v239_v37, 0.0 }
  0xa4   :  { %v282_v41 = vmax.f32 %v252_v39, 0.0 }
  0xa5   :  { %v285_v44 = vpack.c.bf16 %v281_v40, %v281_v40 }
  0xa6   :  { %v286_v46 = vpack.c.bf16 %v282_v41, %v282_v41 }
  0xa7   :  { %687 = vmatmul.bf16.vlgmr.msrb.gmra.mxu0 %v285_v44 }
  0xa8   :  { %v264_v47 = vpop.f32.mrf.mxu2  ;;  %700 = vmatmul.bf16.vlgmr.msrb.gmra.mxu1 %v286_v46  ;;  %v240_v50 = vpop.f32.mrf.mxu0  ;;  %919 = vmatpush.bf16.msrb.mxu0 %v1501_v43  ;;  %v1510_v43 = vld [vmem:[%s2195_s6] ss:$0 sm:$0xff] }
  0xa9   :  { %v265_v48 = vadd.f32 %v264_v47, %v63_v42  ;;  %v277_v49 = vpop.f32.mrf.mxu3  ;;  %v253_v53 = vpop.f32.mrf.mxu1  ;;  %932 = vmatpush.bf16.msrb.mxu1 %v1509_v62 }
  0xaa   :  { %v278_v52 = vadd.f32 %v277_v49, %v64_v45 }
  0xab   :  { %v283_v54 = vmax.f32 %v265_v48, 0.0 }
  0xac   :  { %v284_v55 = vmax.f32 %v278_v52, 0.0  ;;  %920 = vmatpush.bf16.msrb.mxu0 %v1500_v51 }
  0xad   :  { %v287_v56 = vpack.c.bf16 %v283_v54, %v283_v54  ;;  %933 = vmatpush.bf16.msrb.mxu1 %v1508_v1 }
  0xae   :  { %v288_v58 = vpack.c.bf16 %v284_v55, %v284_v55 }
  0xaf   :  { %713 = vmatmul.bf16.vlgmr.msrb.gmra.mxu2 %v287_v56 }
  0xb0   :  { %726 = vmatmul.bf16.vlgmr.msrb.gmra.mxu3 %v288_v58  ;;  %v266_v59 = vpop.f32.mrf.mxu2  ;;  %921 = vmatpush.bf16.msrb.mxu0 %v1499_v57 }
  0xb1   :  { %v279_v60 = vpop.f32.mrf.mxu3  ;;  %934 = vmatpush.bf16.msrb.mxu1 %v1507_v3 }
  0xb4   :  { %922 = vmatpush.bf16.msrb.mxu0 %v1498_v61 }
  0xb5   :  { %935 = vmatpush.bf16.msrb.mxu1 %v1506_v5 }
  0xb7   :  { %739 = vmatmul.bf16.vlgmr.msra.gmra.mxu0 %v285_v44 }
  0xb8   :  { %752 = vmatmul.bf16.vlgmr.msra.gmra.mxu1 %v286_v46  ;;  %923 = vmatpush.bf16.msrb.mxu0 %v1497_v63 }
  0xb9   :  { %936 = vmatpush.bf16.msrb.mxu1 %v1505_v6 }
  0xbc   :  { %924 = vmatpush.bf16.msrb.mxu0 %v1496_v0 }
  0xbd   :  { %937 = vmatpush.bf16.msrb.mxu1 %v1504_v7 }
  0xbf   :  { %765 = vmatmul.bf16.vlgmr.msra.gmra.mxu2 %v287_v56 }
  0xc0   :  { %778 = vmatmul.bf16.vlgmr.msra.gmra.mxu3 %v288_v58  ;;  %925 = vmatpush.bf16.msrb.mxu0 %v1495_v2 }
  0xc1   :  { %938 = vmatpush.bf16.msrb.mxu1 %v1503_v8 }
  0xc4   :  { %926 = vmatpush.bf16.msrb.mxu0 %v1494_v4 }
  0xc5   :  { %939 = vmatpush.bf16.msrb.mxu1 %v1502_v13 }
 0x124   :  { %v688_v10 = vpop.f32.mrf.mxu0 }
 0x125   :  { %v701_v11 = vpop.f32.mrf.mxu1  ;;  %v689_v14 = vadd.f32 %v688_v10, %v355_v12 }
 0x127   :  { %v702_v17 = vadd.f32 %v701_v11, %v689_v14 }
 0x12c   :  { %v690_v15 = vpop.f32.mrf.mxu0 }
 0x12d   :  { %v703_v16 = vpop.f32.mrf.mxu1 }
 0x132   :  { %v714_v18 = vpop.f32.mrf.mxu2 }
 0x133   :  { %v715_v19 = vadd.f32 %v714_v18, %v702_v17  ;;  %v727_v20 = vpop.f32.mrf.mxu3 }
 0x134   :  { %v740_v22 = vpop.f32.mrf.mxu0 }
 0x135   :  { %v728_v21 = vadd.f32 %v727_v20, %v715_v19  ;;  %v753_v23 = vpop.f32.mrf.mxu1  ;;  %v741_v29 = vadd.f32 %v740_v22, %v356_v26 }
 0x137   :  { %v783_v24 = vmax.f32 %v728_v21, 0.0  ;;  %v754_v32 = vadd.f32 %v753_v23, %v741_v29 }
 0x139   :  { %v785_v25 = vpack.c.bf16 %v783_v24, %v783_v24 }
 0x13a   :  { %v716_v27 = vpop.f32.mrf.mxu2 }
 0x13b   :  { %v729_v28 = vpop.f32.mrf.mxu3  ;;  %927 = vmatmul.bf16.vlgmr.msrb.gmra.mxu0 %v785_v25 }
 0x13c   :  { %v742_v30 = vpop.f32.mrf.mxu0 }
 0x13d   :  { %v755_v31 = vpop.f32.mrf.mxu1 }
 0x142   :  { %v766_v33 = vpop.f32.mrf.mxu2 }
 0x143   :  { %v767_v34 = vadd.f32 %v766_v33, %v754_v32  ;;  %v779_v35 = vpop.f32.mrf.mxu3 }
 0x145   :  { %v780_v36 = vadd.f32 %v779_v35, %v767_v34 }
 0x147   :  { %v784_v37 = vmax.f32 %v780_v36, 0.0 }
 0x149   :  { %v786_v38 = vpack.c.bf16 %v784_v37, %v784_v37 }
 0x14a   :  { %v768_v39 = vpop.f32.mrf.mxu2 }
 0x14b   :  { %v781_v40 = vpop.f32.mrf.mxu3  ;;  %940 = vmatmul.bf16.vlgmr.msrb.gmra.mxu1 %v786_v38 }
 0x1b8   :  { %v928_v41 = vpop.f32.mrf.mxu0 }
 0x1b9   :  { %v929_v44 = vadd.f32 %v1510_v43, %v928_v41 }
 0x1c0   :  { %v930_v42 = vpop.f32.mrf.mxu0 }
 0x1c8   :  { %v941_v45 = vpop.f32.mrf.mxu1 }
 0x1c9   :  { %v942_v46 = vadd.f32 %v941_v45, %v929_v44 }
 0x1cb   :  { %945 = vst [vmem:[%s2197_s7] sm:$0xff] %v942_v46 }
 0x1d0   :  { %v943_v47 = vpop.f32.mrf.mxu1 }

</bundles_post_ra>
